<compile_context>
chip_gen: v5e
topology: v5e:2x2
jax: 0.10.0
libtpu: 0.0.40
codegen_flags: <defaults>
</compile_context>

<pallas_src>
import functools

import jax
import jax.numpy as jnp
from jax.experimental import pallas as pl
from jax.experimental.pallas import tpu as pltpu


def _round_up(n, m):
    return ((n + m - 1) // m) * m


def _pad2d(x, rows, cols):
    """Crop-or-zero-pad a 2-D array to (rows, cols)."""
    r = min(x.shape[0], rows)
    c = min(x.shape[1], cols)
    return jnp.zeros((rows, cols), x.dtype).at[:r, :c].set(x[:r, :c])


def _sage_conv_kernel(a_ref, xk_ref, xt_ref, dinv_ref, w_ref, b_ref, o_ref,
                      acc_ref, *, c_out, apply_relu, apply_log_softmax):
    """One (target-row block i, source-K block k) grid step.

    a_ref    (TM, TK)          bf16  edge-count block of the dense adjacency
    xk_ref   (TK, Cin_p)       bf16  source-node features for this K block
    xt_ref   (TM, Cin_p)       bf16  root/target-node features (resident over k)
    dinv_ref (TM, 1)           f32   1/deg (mean normalization)
    w_ref    (2*Cin_p, Cout_p) bf16  stacked [W_l; W_r]
    b_ref    (1, Cout_p)       f32   lin_l bias
    o_ref    (TM, Cout_p)      f32   output block (resident over k)
    acc_ref  (TM, Cin_p)       f32   neighbor-sum accumulator scratch
    """
    k = pl.program_id(1)

    @pl.when(k == 0)
    def _():
        acc_ref[...] = jnp.zeros_like(acc_ref)

    # Steady state is pure MXU-accumulate: neighbor feature sum over source
    # blocks (bf16 inputs, f32 accumulator). Mean scale deferred to epilogue.
    acc_ref[...] += jnp.dot(a_ref[...], xk_ref[...],
                            preferred_element_type=jnp.float32)

    @pl.when(k == pl.num_programs(1) - 1)
    def _():
        # f32 mean normalization, then one fused MXU matmul for lin_l + lin_r.
        agg = acc_ref[...] * dinv_ref[...]                        # (TM, Cin_p)
        h = jnp.concatenate([agg.astype(jnp.bfloat16), xt_ref[...]], axis=-1)
        out = jnp.dot(h, w_ref[...], preferred_element_type=jnp.float32)
        out = out + b_ref[...]
        if apply_relu:
            out = jnp.maximum(out, 0.0)
        if apply_log_softmax:
            # Mask padded output channels so they don't perturb the softmax.
            col = jax.lax.broadcasted_iota(jnp.int32, out.shape, 1)
            valid = col < c_out
            z = jnp.where(valid, out, jnp.full_like(out, -1e30))
            m = jnp.max(z, axis=-1, keepdims=True)
            s = z - m
            p = jnp.where(valid, jnp.exp(s), jnp.zeros_like(s))
            out = s - jnp.log(jnp.sum(p, axis=-1, keepdims=True))
        o_ref[...] = out.astype(o_ref.dtype)


def sage_conv(a_counts, x, w_l, w_r, b, *, apply_relu, apply_log_softmax,
              tm_max=256, tk_max=512):
    """One SAGEConv (mean aggregation) fused with relu / log_softmax.

    a_counts : [n_tgt, n_src] f32 dense edge counts (unnormalized).
    x        : node features; rows [0, n_tgt) are also the target nodes
               (x_target == x[:n_tgt]); columns beyond w_l.shape[0] (if any)
               are ignored by construction (zero weight rows).
    Returns a row/channel padded [n_tgt_pad, c_out_pad] f32 array.
    """
    n_tgt, n_src = a_counts.shape
    c_in, c_out = w_l.shape

    # Tile sizes: TM for target rows (8/16-aligned), TK a multiple of 128
    # (lane dim of A, sublane dim of X). tm_max/tk_max keep the double-buffered
    # working set far below the v7x 64 MiB VMEM even at large graph sizes.
    tm = min(tm_max, _round_up(n_tgt, 16))
    tk = min(tk_max, _round_up(n_src, 128))
    c_in_p = _round_up(c_in, 128)
    c_out_p = _round_up(c_out, 128)
    n_tgt_p = _round_up(n_tgt, tm)
    n_src_p = _round_up(n_src, tk)
    n_x_p = max(n_src_p, n_tgt_p)   # x serves both the K stream and root rows

    # f32 1/deg, applied in the epilogue (keeps the bf16 A tiles exact ints).
    deg = jnp.sum(a_counts, axis=1, keepdims=True)
    dinv = jnp.zeros((n_tgt_p, 1), jnp.float32).at[:n_tgt].set(
        1.0 / jnp.maximum(deg, 1.0))

    a_p = _pad2d(a_counts, n_tgt_p, n_src_p).astype(jnp.bfloat16)
    x_p = _pad2d(x, n_x_p, c_in_p).astype(jnp.bfloat16)

    # Stacked weight so lin_l(agg) + lin_r(x_target) is a single MXU matmul.
    w = jnp.zeros((2 * c_in_p, c_out_p), jnp.float32)
    w = w.at[:c_in, :c_out].set(w_l)
    w = w.at[c_in_p:c_in_p + c_in, :c_out].set(w_r)
    w = w.astype(jnp.bfloat16)
    b_p = jnp.zeros((1, c_out_p), jnp.float32).at[0, :c_out].set(
        jnp.reshape(b, (-1,)))

    grid = (n_tgt_p // tm, n_src_p // tk)
    kernel = functools.partial(_sage_conv_kernel, c_out=c_out,
                               apply_relu=apply_relu,
                               apply_log_softmax=apply_log_softmax)
    return pl.pallas_call(
        kernel,
        out_shape=jax.ShapeDtypeStruct((n_tgt_p, c_out_p), jnp.float32),
        grid_spec=pltpu.PrefetchScalarGridSpec(
            num_scalar_prefetch=0,
            grid=grid,
            in_specs=[
                pl.BlockSpec((tm, tk), lambda i, k: (i, k)),            # A counts
                pl.BlockSpec((tk, c_in_p), lambda i, k: (k, 0)),        # X (K stream)
                pl.BlockSpec((tm, c_in_p), lambda i, k: (i, 0)),        # X root rows
                pl.BlockSpec((tm, 1), lambda i, k: (i, 0)),             # 1/deg
                pl.BlockSpec((2 * c_in_p, c_out_p), lambda i, k: (0, 0)),  # [W_l;W_r]
                pl.BlockSpec((1, c_out_p), lambda i, k: (0, 0)),        # bias
            ],
            out_specs=pl.BlockSpec((tm, c_out_p), lambda i, k: (i, 0)),
            scratch_shapes=[pltpu.VMEM((tm, c_in_p), jnp.float32)],
        ),
        compiler_params=pltpu.CompilerParams(
            dimension_semantics=("parallel", "arbitrary"),
            vmem_limit_bytes=48 * 1024 * 1024,
        ),
    )(a_p, x_p, x_p, dinv, w, b_p)


def dense_count_adj(edge_index, n_src, n_tgt):
    """edge_index int32 [2, E]: row 0 = source node id, row 1 = target id.

    Returns unnormalized edge counts (mean normalization happens in-kernel in
    f32 so the bf16 adjacency tiles stay exact small integers).
    """
    # TODO(synk): for real graph sizes, replace this dense O(n_tgt*n_src)
    # adjacency with a CSR edge-list gather-accumulate kernel using
    # PrefetchScalarGridSpec scalar prefetch (O(E*C) work instead).
    src, dst = edge_index[0], edge_index[1]
    return jnp.zeros((n_tgt, n_src), jnp.float32).at[dst, src].add(1.0)


def sage_forward(x, adjs, params):
    """x: [N0, in_channels]; adjs: list of (edge_index, size=(n_src, n_tgt))."""
    num_layers = len(params)
    for i, (edge_index, size) in enumerate(adjs):
        n_src, n_tgt = size
        a = dense_count_adj(edge_index, n_src, n_tgt)
        last = (i == num_layers - 1)
        x = sage_conv(a, x, params[i]["w_l"], params[i]["w_r"], params[i]["b"],
                      apply_relu=not last, apply_log_softmax=last)
        # TODO(synk): F.dropout(p=0.5) is identity in eval mode (training=False),
        # so it is intentionally omitted.
        # TODO(synk): the two layers could be fused into a single pallas_call
        # keeping the hidden activation in VMEM; kept separate for generality.
    n_out = adjs[-1][1][1]
    c_out = params[-1]["w_l"].shape[1]
    return x[:n_out, :c_out]


def sage_reference(x, adjs, params):
    """Pure-JAX f32 reference (scatter-mean SAGEConv) for validation."""
    num_layers = len(params)
    for i, (edge_index, size) in enumerate(adjs):
        n_src, n_tgt = size
        src, dst = edge_index[0], edge_index[1]
        x_target = x[:n_tgt]
        summ = jnp.zeros((n_tgt, x.shape[1]), jnp.float32).at[dst].add(x[src])
        deg = jnp.zeros((n_tgt, 1), jnp.float32).at[dst].add(1.0)
        agg = summ / jnp.maximum(deg, 1.0)
        out = (agg @ params[i]["w_l"] + x_target @ params[i]["w_r"]
               + params[i]["b"][None, :])
        if i != num_layers - 1:
            out = jnp.maximum(out, 0.0)
        else:
            out = jax.nn.log_softmax(out, axis=-1)
        x = out
    return x


def glorot(key, shape):
    lim = (6.0 / (shape[0] + shape[1])) ** 0.5
    return jax.random.uniform(key, shape, jnp.float32, -lim, lim)


if __name__ == "__main__":
    key = jax.random.PRNGKey(0)
    keys = iter(jax.random.split(key, 12))

    in_ch, hid_ch, out_ch = 32, 32, 16
    n0, n1, n2 = 64, 32, 16      # nodes per hop (outermost -> root batch)
    e0, e1 = 256, 96             # sampled edges per layer

    # node features
    x = jax.random.normal(next(keys), (n0, in_ch), jnp.float32)

    # sampled bipartite edge indices: row 0 = src (rows of this layer's x),
    # row 1 = dst (first n_tgt rows of this layer's x)
    ei0 = jnp.stack([jax.random.randint(next(keys), (e0,), 0, n0),
                     jax.random.randint(next(keys), (e0,), 0, n1)]).astype(jnp.int32)
    ei1 = jnp.stack([jax.random.randint(next(keys), (e1,), 0, n1),
                     jax.random.randint(next(keys), (e1,), 0, n2)]).astype(jnp.int32)
    adjs = [(ei0, (n0, n1)), (ei1, (n1, n2))]

    # weights stored transposed as (in, out) so the kernel computes x @ W
    # (== PyTorch x @ W_torch.T). lin_l has bias, lin_r has no bias.
    params = [
        dict(w_l=glorot(next(keys), (in_ch, hid_ch)),
             w_r=glorot(next(keys), (in_ch, hid_ch)),
             b=0.1 * jax.random.normal(next(keys), (hid_ch,), jnp.float32)),
        dict(w_l=glorot(next(keys), (hid_ch, out_ch)),
             w_r=glorot(next(keys), (hid_ch, out_ch)),
             b=0.1 * jax.random.normal(next(keys), (out_ch,), jnp.float32)),
    ]

    out = jax.block_until_ready(sage_forward(x, adjs, params))
    assert out.shape == (n2, out_ch), out.shape

    # compare against a pure-JAX f32 reference (kernel uses bf16 MXU inputs,
    # f32 accumulate + f32 epilogue, so a loose tolerance applies)
    ref = sage_reference(x, adjs, params)
    max_err = float(jnp.max(jnp.abs(out - ref)))
    assert max_err < 0.2, max_err
    # log_softmax rows must sum to 1 in probability space
    assert bool(jnp.all(jnp.abs(jnp.sum(jnp.exp(out), axis=-1) - 1.0) < 1e-4))
    print("KERNEL_OK")
</pallas_src>

<mosaic_0001>
module attributes {stable_mosaic.version = 11 : i64} {
  func.func @_sage_conv_kernel(%arg0: i32, %arg1: i32, %arg2: memref<32x128xbf16, #tpu.memory_space<vmem>>, %arg3: memref<128x128xbf16, #tpu.memory_space<vmem>>, %arg4: memref<32x128xbf16, #tpu.memory_space<vmem>>, %arg5: memref<32x1xf32, #tpu.memory_space<vmem>>, %arg6: memref<256x128xbf16, #tpu.memory_space<vmem>>, %arg7: memref<1x128xf32, #tpu.memory_space<vmem>>, %arg8: memref<32x128xf32, #tpu.memory_space<vmem>>, %arg9: memref<32x128xf32, #tpu.memory_space<vmem>>) attributes {dimension_semantics = [#tpu.dimension_semantics<parallel>, #tpu.dimension_semantics<arbitrary>], iteration_bounds = array<i64: 1, 1>, scalar_prefetch = 0 : i64, scratch_operands = 1 : i64, tpu.core_type = #tpu.core_type<tc>, window_params = [{transform_indices = @transform_0, window_bounds = array<i64: 32, 128>}, {transform_indices = @transform_1, window_bounds = array<i64: 128, 128>}, {transform_indices = @transform_2, window_bounds = array<i64: 32, 128>}, {transform_indices = @transform_3, window_bounds = array<i64: 32, 1>}, {pipeline_mode = #tpu.pipeline_mode<synchronous>, transform_indices = @transform_4, window_bounds = array<i64: 256, 128>}, {pipeline_mode = #tpu.pipeline_mode<synchronous>, transform_indices = @transform_5, window_bounds = array<i64: 1, 128>}, {transform_indices = @transform_6, window_bounds = array<i64: 32, 128>}]} {
    %c0_i32 = arith.constant 0 : i32
    %0 = arith.cmpi eq, %arg1, %c0_i32 : i32
    %1 = arith.extui %0 : i1 to i32
    %c0_i32_0 = arith.constant 0 : i32
    %2 = arith.cmpi ne, %1, %c0_i32_0 : i32
    scf.if %2 {
      %cst_10 = arith.constant 0.000000e+00 : f32
      %12 = vector.broadcast %cst_10 : f32 to vector<32x128xf32>
      %c0_11 = arith.constant 0 : index
      %c0_12 = arith.constant 0 : index
      %13 = vector.load %arg9[%c0_11, %c0_12] : memref<32x128xf32, #tpu.memory_space<vmem>>, vector<32x128xf32>
      tpu.vector_store %arg9[%c0_11, %c0_12], %12 {strides = array<i32>} : memref<32x128xf32, #tpu.memory_space<vmem>>, vector<32x128xf32>,
    } else {
    }
    %c0 = arith.constant 0 : index
    %c0_1 = arith.constant 0 : index
    %3 = vector.load %arg9[%c0, %c0_1] : memref<32x128xf32, #tpu.memory_space<vmem>>, vector<32x128xf32>
    %c0_2 = arith.constant 0 : index
    %c0_3 = arith.constant 0 : index
    %4 = vector.load %arg2[%c0_2, %c0_3] : memref<32x128xbf16, #tpu.memory_space<vmem>>, vector<32x128xbf16>
    %c0_4 = arith.constant 0 : index
    %c0_5 = arith.constant 0 : index
    %5 = vector.load %arg3[%c0_4, %c0_5] : memref<128x128xbf16, #tpu.memory_space<vmem>>, vector<128x128xbf16>
    %cst = arith.constant dense<0.000000e+00> : vector<32x128xf32>
    %6 = tpu.matmul %4, %5, %cst {dimension_numbers = #tpu.dot_dimension_numbers<[1], [0], [0], [1], [0, 0, 1, 1], [], []>} : vector<32x128xbf16>, vector<128x128xbf16>, vector<32x128xf32> -> vector<32x128xf32>
    %7 = arith.addf %3, %6 : vector<32x128xf32>
    %c0_6 = arith.constant 0 : index
    %c0_7 = arith.constant 0 : index
    %8 = vector.load %arg9[%c0_6, %c0_7] : memref<32x128xf32, #tpu.memory_space<vmem>>, vector<32x128xf32>
    tpu.vector_store %arg9[%c0_6, %c0_7], %7 {strides = array<i32>} : memref<32x128xf32, #tpu.memory_space<vmem>>, vector<32x128xf32>,
    %c0_i32_8 = arith.constant 0 : i32
    %9 = arith.cmpi eq, %arg1, %c0_i32_8 : i32
    %10 = arith.extui %9 : i1 to i32
    %c0_i32_9 = arith.constant 0 : i32
    %11 = arith.cmpi ne, %10, %c0_i32_9 : i32
    scf.if %11 {
      %c0_10 = arith.constant 0 : index
      %c0_11 = arith.constant 0 : index
      %12 = vector.load %arg9[%c0_10, %c0_11] : memref<32x128xf32, #tpu.memory_space<vmem>>, vector<32x128xf32>
      %c0_12 = arith.constant 0 : index
      %c0_13 = arith.constant 0 : index
      %13 = vector.load %arg5[%c0_12, %c0_13] : memref<32x1xf32, #tpu.memory_space<vmem>>, vector<32x1xf32>
      %14 = vector.broadcast %13 : vector<32x1xf32> to vector<32x128xf32>
      %15 = arith.mulf %12, %14 : vector<32x128xf32>
      %16 = arith.truncf %15 : vector<32x128xf32> to vector<32x128xbf16>
      %c0_14 = arith.constant 0 : index
      %c0_15 = arith.constant 0 : index
      %17 = vector.load %arg4[%c0_14, %c0_15] : memref<32x128xbf16, #tpu.memory_space<vmem>>, vector<32x128xbf16>
      %18 = tpu.concatenate %16, %17 in 1 : vector<32x128xbf16>, vector<32x128xbf16> -> vector<32x256xbf16>
      %c0_16 = arith.constant 0 : index
      %c0_17 = arith.constant 0 : index
      %19 = vector.load %arg6[%c0_16, %c0_17] : memref<256x128xbf16, #tpu.memory_space<vmem>>, vector<256x128xbf16>
      %cst_18 = arith.constant dense<0.000000e+00> : vector<32x128xf32>
      %20 = tpu.matmul %18, %19, %cst_18 {dimension_numbers = #tpu.dot_dimension_numbers<[1], [0], [0], [1], [0, 0, 1, 1], [], []>} : vector<32x256xbf16>, vector<256x128xbf16>, vector<32x128xf32> -> vector<32x128xf32>
      %c0_19 = arith.constant 0 : index
      %c0_20 = arith.constant 0 : index
      %21 = vector.load %arg7[%c0_19, %c0_20] : memref<1x128xf32, #tpu.memory_space<vmem>>, vector<1x128xf32>
      %22 = vector.broadcast %21 : vector<1x128xf32> to vector<32x128xf32>
      %23 = arith.addf %20, %22 : vector<32x128xf32>
      %cst_21 = arith.constant 0.000000e+00 : f32
      %24 = vector.broadcast %cst_21 : f32 to vector<32x128xf32>
      %25 = arith.maximumf %23, %24 : vector<32x128xf32>
      %c0_22 = arith.constant 0 : index
      %c0_23 = arith.constant 0 : index
      %26 = vector.load %arg8[%c0_22, %c0_23] : memref<32x128xf32, #tpu.memory_space<vmem>>, vector<32x128xf32>
      tpu.vector_store %arg8[%c0_22, %c0_23], %25 {strides = array<i32>} : memref<32x128xf32, #tpu.memory_space<vmem>>, vector<32x128xf32>,
    } else {
    }
    return
  }
  func.func @transform_0(%arg0: i32, %arg1: i32) -> (i32, i32) {
    %c0_i32 = arith.constant 0 : i32
    return %arg0, %arg1 : i32, i32
  }
  func.func @transform_1(%arg0: i32, %arg1: i32) -> (i32, i32) {
    %c0_i32 = arith.constant 0 : i32
    %c0_i32_0 = arith.constant 0 : i32
    return %arg1, %c0_i32 : i32, i32
  }
  func.func @transform_2(%arg0: i32, %arg1: i32) -> (i32, i32) {
    %c0_i32 = arith.constant 0 : i32
    %c0_i32_0 = arith.constant 0 : i32
    return %arg0, %c0_i32 : i32, i32
  }
  func.func @transform_3(%arg0: i32, %arg1: i32) -> (i32, i32) {
    %c0_i32 = arith.constant 0 : i32
    %c0_i32_0 = arith.constant 0 : i32
    return %arg0, %c0_i32 : i32, i32
  }
  func.func @transform_4(%arg0: i32, %arg1: i32) -> (i32, i32) {
    %c0_i32 = arith.constant 0 : i32
    %c0_i32_0 = arith.constant 0 : i32
    %c0_i32_1 = arith.constant 0 : i32
    return %c0_i32, %c0_i32_0 : i32, i32
  }
  func.func @transform_5(%arg0: i32, %arg1: i32) -> (i32, i32) {
    %c0_i32 = arith.constant 0 : i32
    %c0_i32_0 = arith.constant 0 : i32
    %c0_i32_1 = arith.constant 0 : i32
    return %c0_i32, %c0_i32_0 : i32, i32
  }
  func.func @transform_6(%arg0: i32, %arg1: i32) -> (i32, i32) {
    %c0_i32 = arith.constant 0 : i32
    %c0_i32_0 = arith.constant 0 : i32
    return %arg0, %c0_i32 : i32, i32
  }
}

</mosaic_0001>

<bundles_post_ra>
// kernel: tpu_custom_call.1
= control target key start
LH: loop header
LB: loop body
LE: loop exit
PB: predicated region body
PF: predicated region fallthrough
CT: control target
= control target key end

     0   :  { %11 = vsyncpa [#allocation4], 0  ;;  %s794_s0 = inlined_call_operand.vmem [shape: bf16[32,128], index: 0, kind: input, shape index: {}]   ;;  %s795_s1 = inlined_call_operand.hbm [shape: bf16[128,128], index: 1, kind: input, shape index: {}]   ;;  %s796_s2 = inlined_call_operand.hbm [shape: bf16[128,128], index: 2, kind: input, shape index: {}]   ;;  %s797_s3 = inlined_call_operand.vmem [shape: f32[32,1], index: 3, kind: input, shape index: {}]   ;;  %s798_s4 = inlined_call_operand.hbm [shape: bf16[256,128], index: 4, kind: input, shape index: {}]   ;;  %s799_s5 = inlined_call_operand.vmem [shape: f32[1,128], index: 5, kind: input, shape index: {}]   ;;  %s800_s6 = inlined_call_operand.hbm [shape: f32[32,128], index: 6, kind: output, shape index: {}]  }
   0x1   :  { %12 = vsyncpa [#allocation7], 0 }
   0x2   :  { %13 = vsyncpa [#allocation5], 0  ;;  %s33_s23 = sshll.u32 %s796_s2, 4  ;;  %s717_s24 = smov [#allocation6]   ;;  %s34_s23 = int_to_ptr.hbm [resolvable:$true] %s33_s23 }
   0x3   :  { %s35_s25 = sshll.u32 %s717_s24, 4  ;;  %s20_s28 = sshll.u32 %s795_s1, 4  ;;  %s36_s25 = int_to_ptr.vmem [resolvable:$true] %s35_s25  ;;  %s21_s28 = int_to_ptr.hbm [resolvable:$true] %s20_s28 }
   0x4   :  { %s718_s29 = smov 64   ;;  %s719_s30 = smov 4  }
   0x5   :  { %41 = dma.hbm_to_vmem [thread:$0]  %s34_s23, 256, %s36_s25, [#allocation7], %s718_s29, %s718_s29, %s719_s30  }
   0x6   :  { %s720_s7 = smov [#allocation3]   ;;  %s48_s11 = sshll.u32 %s798_s4, 4  ;;  %s49_s11 = int_to_ptr.hbm [resolvable:$true] %s48_s11 }
   0x7   :  { %s22_s8 = sshll.u32 %s720_s7, 4  ;;  %s721_s2 = smov [#allocation8]   ;;  %s23_s8 = int_to_ptr.vmem [resolvable:$true] %s22_s8 }
   0x8   :  { %28 = dma.hbm_to_vmem [thread:$0]  %s21_s28, 1024, %s23_s8, [#allocation4], %s718_s29, %s718_s29, %s719_s30  }
   0x9   :  { %s50_s12 = sshll.u32 %s721_s2, 4  ;;  %s51_s12 = int_to_ptr.vmem [resolvable:$true] %s50_s12 }
   0xa   :  { %56 = dma.hbm_to_vmem [thread:$0]  %s49_s11, 2048, %s51_s12, [#allocation7], %s718_s29, %s718_s29, %s719_s30  }
   0xb   :  { %711 = dma.done.wait [#allocation4], 1024  }
   0xc   :  { %712 = vsyncadd [#allocation4], 4294966272 }
   0xd   :  { %713 = dma.done.wait [#allocation7], 2304  }
   0xe   :  { %714 = vsyncadd [#allocation7], 4294964992  ;;  %v576_v0 = vld [vmem:[#allocation3 + $0x38] sm:$0xff]  ;;  %v575_v1 = vld [vmem:[#allocation3 + $0x30] sm:$0xff]  ;;  %v722_v2 = vmov 0   ;;  %s441_s26 = sshll.u32 %s800_s6, 4  ;;  %s442_s26 = int_to_ptr.hbm [resolvable:$true] %s441_s26 }
   0xf   :  { %163 = vmatpush.bf16.msra.mxu0 %v576_v0  ;;  %595 = vmatpush.bf16.msra.mxu3 %v576_v0  ;;  %v197_v3 = vld [vmem:[%s797_s3] sm:$0xff]  ;;  %v199_v4 = vld [vmem:[%s797_s3 + $0x10] sm:$0xff]  ;;  %v594_v5 = vld [vmem:[#allocation8 + $0x78] sm:$0xff]  ;;  %s724_s27 = smov 128   ;;  %s725_s28 = smov 8  }
  0x10   :  { %612 = vset.pattern.permute.xlu0 %v722_v2  ;;  %613 = vset.pattern.permute.xlu1 %v722_v2  ;;  %v586_v6 = vld [vmem:[#allocation8 + $0x38] sm:$0xff]  ;;  %v593_v8 = vld [vmem:[#allocation8 + $0x70] sm:$0xff]  ;;  %v200_v12 = vld [vmem:[%s797_s3 + $0x18] sm:$0xff] }
  0x11   :  { %203 = vperm.xlu0 %612, %v197_v3   ;;  %213 = vperm.xlu1 %613, %v199_v4   ;;  %v574_v7 = vld [vmem:[#allocation3 + $0x28] sm:$0xff]  ;;  %v585_v9 = vld [vmem:[#allocation8 + $0x30] sm:$0xff]  ;;  %v592_v13 = vld [vmem:[#allocation8 + $0x68] sm:$0xff] }
  0x12   :  { %408 = vmatpush.bf16.msra.mxu2 %v594_v5  ;;  %389 = vmatpush.bf16.msra.mxu1 %v586_v6  ;;  %v198_v10 = vld [vmem:[%s797_s3 + $0x8] sm:$0xff]  ;;  %v573_v11 = vld [vmem:[#allocation3 + $0x20] sm:$0xff]  ;;  %v572_v14 = vld [vmem:[#allocation3 + $0x18] sm:$0xff] }
  0x13   :  { %164 = vmatpush.bf16.msra.mxu0 %v575_v1  ;;  %596 = vmatpush.bf16.msra.mxu3 %v575_v1  ;;  %v591_v15 = vld [vmem:[#allocation8 + $0x60] sm:$0xff]  ;;  %v590_v17 = vld [vmem:[#allocation8 + $0x58] sm:$0xff]  ;;  %v569_v19 = vld [vmem:[#allocation3] sm:$0xff] }
  0x14   :  { %v571_v16 = vld [vmem:[#allocation3 + $0x10] sm:$0xff]  ;;  %v570_v18 = vld [vmem:[#allocation3 + $0x8] sm:$0xff]  ;;  %v567_v20 = vld [vmem:[%s794_s0] sm:$0xff] }
  0x15   :  { %v568_v21 = vld [vmem:[%s794_s0 + $0x8] sm:$0xff]  ;;  %v584_v22 = vld [vmem:[#allocation8 + $0x28] sm:$0xff]  ;;  %v589_v23 = vld [vmem:[#allocation8 + $0x50] sm:$0xff] }
  0x16   :  { %409 = vmatpush.bf16.msra.mxu2 %v593_v8  ;;  %390 = vmatpush.bf16.msra.mxu1 %v585_v9  ;;  %v583_v24 = vld [vmem:[#allocation8 + $0x20] sm:$0xff]  ;;  %v588_v25 = vld [vmem:[#allocation8 + $0x48] sm:$0xff]  ;;  %v582_v26 = vld [vmem:[#allocation8 + $0x18] sm:$0xff] }
  0x17   :  { %165 = vmatpush.bf16.msra.mxu0 %v574_v7  ;;  %597 = vmatpush.bf16.msra.mxu3 %v574_v7  ;;  %v587_v27 = vld [vmem:[#allocation8 + $0x40] sm:$0xff]  ;;  %v577_v28 = vld [vmem:[#allocation6] sm:$0xff]  ;;  %v580_v30 = vld [vmem:[#allocation8 + $0x8] sm:$0xff] }
  0x18   :  { %v581_v29 = vld [vmem:[#allocation8 + $0x10] sm:$0xff]  ;;  %v579_v31 = vld [vmem:[#allocation8] sm:$0xff]  ;;  %v578_v32 = vld [vmem:[#allocation6 + $0x8] sm:$0xff] }
  0x19   :  { %208 = vperm.xlu0 %612, %v198_v10   ;;  %218 = vperm.xlu1 %613, %v200_v12   ;;  %v614_v56 = vld [vmem:[%s799_s5] ss:$0 sm:$0xff]  ;;  %s723_s5 = smov [#allocation9]  }
  0x1a   :  { %410 = vmatpush.bf16.msra.mxu2 %v592_v13  ;;  %391 = vmatpush.bf16.msra.mxu1 %v584_v22  ;;  %s439_s23 = sshll.u32 %s723_s5, 4  ;;  %s440_s23 = int_to_ptr.vmem [resolvable:$true] %s439_s23 }
  0x1b   :  { %166 = vmatpush.bf16.msra.mxu0 %v573_v11  ;;  %598 = vmatpush.bf16.msra.mxu3 %v573_v11 }
  0x1e   :  { %411 = vmatpush.bf16.msra.mxu2 %v591_v15  ;;  %392 = vmatpush.bf16.msra.mxu1 %v583_v24 }
  0x1f   :  { %167 = vmatpush.bf16.msra.mxu0 %v572_v14  ;;  %599 = vmatpush.bf16.msra.mxu3 %v572_v14 }
  0x22   :  { %412 = vmatpush.bf16.msra.mxu2 %v590_v17  ;;  %393 = vmatpush.bf16.msra.mxu1 %v582_v26 }
  0x23   :  { %168 = vmatpush.bf16.msra.mxu0 %v571_v16  ;;  %600 = vmatpush.bf16.msra.mxu3 %v571_v16 }
  0x26   :  { %413 = vmatpush.bf16.msra.mxu2 %v589_v23  ;;  %394 = vmatpush.bf16.msra.mxu1 %v581_v29 }
  0x27   :  { %169 = vmatpush.bf16.msra.mxu0 %v570_v18  ;;  %601 = vmatpush.bf16.msra.mxu3 %v570_v18 }
  0x2a   :  { %414 = vmatpush.bf16.msra.mxu2 %v588_v25  ;;  %395 = vmatpush.bf16.msra.mxu1 %v580_v30 }
  0x2b   :  { %170 = vmatpush.bf16.msra.mxu0 %v569_v19  ;;  %602 = vmatpush.bf16.msra.mxu3 %v569_v19 }
  0x2e   :  { %171 = vmatmul.bf16.vlgmr.msra.gmra.mxu0 %v567_v20  ;;  %176 = vmatmul.bf16.vlgmr.msra.gmra.mxu3 %v568_v21 }
  0x2f   :  { %415 = vmatpush.bf16.msra.mxu2 %v587_v27  ;;  %396 = vmatpush.bf16.msra.mxu1 %v579_v31 }
  0x32   :  { %416 = vmatmul.bf16.vlgmr.msra.gmra.mxu2 %v577_v28 }
  0x42   :  { %421 = vmatmul.bf16.gmra.mxu2 %v578_v32 }
  0x83   :  { %v204_v33 = vpop.permute.xlu0 %203  ;;  %v214_v36 = vpop.permute.xlu1 %213 }
  0x8b   :  { %v209_v38 = vpop.permute.xlu0 %208  ;;  %v219_v46 = vpop.permute.xlu1 %218 }
  0xab   :  { %v172_v34 = vpop.f32.mrf.mxu0 }
  0xac   :  { %v221_v35 = vmul.f32 %v204_v33, %v172_v34 }
  0xae   :  { %v225_v40 = vpack.c.bf16 %v221_v35, %v221_v35 }
  0xb0   :  { %v237_v43 = vunpack.c.l.b16 %v225_v40 }
  0xb1   :  { %v177_v37 = vpop.f32.mrf.mxu3 }
  0xb2   :  { %v223_v48 = vmul.f32 %v214_v36, %v177_v37 }
  0xb3   :  { %v174_v39 = vpop.f32.mrf.mxu0 }
  0xb4   :  { %v222_v41 = vmul.f32 %v209_v38, %v174_v39  ;;  %v227_v50 = vpack.c.bf16 %v223_v48, %v223_v48 }
  0xb5   :  { %v417_v55 = vpop.f32.mrf.mxu2 }
  0xb6   :  { %v226_v42 = vpack.c.bf16 %v222_v41, %v222_v41  ;;  %v239_v52 = vunpack.c.l.b16 %v227_v50 }
  0xb8   :  { %v238_v44 = vunpack.c.l.b16 %v226_v42 }
  0xb9   :  { %v179_v47 = vpop.f32.mrf.mxu3 }
  0xba   :  { %v241_v45 = vpack.c.b16 %v238_v44, %v237_v43  ;;  %v224_v49 = vmul.f32 %v219_v46, %v179_v47 }
  0xbc   :  { %397 = vmatmul.bf16.vlgmr.msra.gmra.mxu1 %v241_v45  ;;  %v228_v51 = vpack.c.bf16 %v224_v49, %v224_v49 }
  0xbd   :  { %v419_v61 = vpop.f32.mrf.mxu2 }
  0xbe   :  { %v240_v53 = vunpack.c.l.b16 %v228_v51 }
  0xc0   :  { %v242_v54 = vpack.c.b16 %v240_v53, %v239_v52 }
  0xc5   :  { %v422_v2 = vpop.f32.mrf.mxu2 }
  0xcc   :  { %402 = vmatmul.bf16.gmra.mxu1 %v242_v54 }
  0xcd   :  { %v424_v9 = vpop.f32.mrf.mxu2 }
 0x139   :  { %v398_v57 = vpop.f32.mrf.mxu1 }
 0x13a   :  { %v399_v58 = vadd.f32 %v614_v56, %v398_v57 }
 0x13c   :  { %v418_v59 = vadd.f32 %v417_v55, %v399_v58 }
 0x13e   :  { %v427_v60 = vmax.f32 %v418_v59, 0.0 }
 0x140   :  { %431 = vst [vmem:[#allocation9] sm:$0xff] %v427_v60 }
 0x141   :  { %v400_v62 = vpop.f32.mrf.mxu1 }
 0x142   :  { %v401_v63 = vadd.f32 %v614_v56, %v400_v62 }
 0x144   :  { %v420_v0 = vadd.f32 %v419_v61, %v401_v63 }
 0x146   :  { %v428_v1 = vmax.f32 %v420_v0, 0.0 }
 0x148   :  { %432 = vst [vmem:[#allocation9 + $0x8] sm:$0xff] %v428_v1 }
 0x149   :  { %v403_v3 = vpop.f32.mrf.mxu1 }
 0x14a   :  { %v404_v4 = vadd.f32 %v614_v56, %v403_v3 }
 0x14c   :  { %v423_v5 = vadd.f32 %v422_v2, %v404_v4 }
 0x14e   :  { %v429_v6 = vmax.f32 %v423_v5, 0.0 }
 0x150   :  { %433 = vst [vmem:[#allocation9 + $0x10] sm:$0xff] %v429_v6 }
 0x151   :  { %v405_v7 = vpop.f32.mrf.mxu1 }
 0x152   :  { %v406_v8 = vadd.f32 %v614_v56, %v405_v7 }
 0x154   :  { %v425_v10 = vadd.f32 %v424_v9, %v406_v8 }
 0x156   :  { %v430_v11 = vmax.f32 %v425_v10, 0.0 }
 0x158   :  { %434 = vst [vmem:[#allocation9 + $0x18] sm:$0xff] %v430_v11 }
 0x159   :  { %447 = dma.vmem_to_hbm [thread:$0]  %s440_s23, 512, %s442_s26, [#allocation5], %s724_s27, %s724_s27, %s725_s28  }
 0x15a   :  { %715 = dma.done.wait [#allocation5], 512  }
 0x15b   :  { %716 = vsyncadd [#allocation5], 4294966784 }
 0x15c   :  { %452 = vsyncpa [#allocation4], 1 }
 0x15d   :  { %453 = vsyncpa [#allocation7], 1 }
 0x15e   :  { %454 = vsyncpa [#allocation5], 1 }

</bundles_post_ra>
